<compile_context>
chip_gen: v6e
topology: v6e:2x2x1
jax: 0.10.0
libtpu: 0.0.40
codegen_flags: <defaults>
</compile_context>

<pallas_src>
import jax
import jax.numpy as jnp
from jax.experimental import pallas as pl
from jax.experimental.pallas import tpu as pltpu

_IN_FEATURES = 784
_H1 = 20
_H2 = 10
_NUM_CLASSES = 10
_OUT_PAD = 128  # lane-dense padded output width (real classes = 10)


def _round_up(x, m):
    return ((x + m - 1) // m) * m


def _mlp_kernel(x_ref, w1_ref, b1_ref, w2_ref, b2_ref, w3_ref, b3_ref, o_ref):
    """Whole forward pass (matmuls + ReLU + log_softmax) for one batch tile."""
    # fc1: x and w1 share the streaming dtype (bf16 by default) -> single-pass
    # bf16 MXU with f32 accumulation; no f32 upcast copy of the x tile.
    h1 = jnp.dot(x_ref[...], w1_ref[...],
                 preferred_element_type=jnp.float32) + b1_ref[...]
    h1 = jnp.maximum(h1, 0.0)

    # fc2 + ReLU (tiny 20x10 matmul; keep f32 for accuracy — negligible MXU time)
    h2 = jnp.dot(h1, w2_ref[...], preferred_element_type=jnp.float32) + b2_ref[...]
    h2 = jnp.maximum(h2, 0.0)

    # fc3 (padded to 128 lanes: zero weights / -1e30 bias on pad lanes, so they
    # are never the row max and exp() underflows to 0 in the denominator)
    logits = jnp.dot(h2, w3_ref[...], preferred_element_type=jnp.float32) + b3_ref[...]

    # log_softmax along dim=1 (numerically stable)
    m = jnp.max(logits, axis=-1, keepdims=True)
    shifted = logits - m
    lse = jnp.log(jnp.sum(jnp.exp(shifted), axis=-1, keepdims=True))
    o_ref[...] = (shifted - lse).astype(o_ref.dtype)


def net_dnn_forward(x, params, *, batch_tile=1024,
                    input_dtype=jnp.bfloat16,
                    output_dtype=jnp.bfloat16,
                    return_padded=False,
                    x_buffers=2):
    """x: any shape that flattens to (-1, 784), like PyTorch's x.view(-1, 784).

    batch_tile: rows per grid step (v5e: ~1024 is already ~HBM roofline;
                v7x: sweep 2048-4096 with bf16 x).
    input_dtype / output_dtype: jnp.bfloat16 (default, halves HBM traffic) or
                jnp.float32 for a strict-accuracy path.
    return_padded: return the raw (B_pad, 128) kernel output (cols 10..127 are
                pad garbage) so the consumer can slice/fuse instead of an extra
                XLA copy here.
    x_buffers: pipeline depth for the x stream (3 on v7x if xprof shows
                exposed DMA at step boundaries).
    """
    w1, b1, w2, b2, w3, b3 = params
    x2d = x.reshape(-1, _IN_FEATURES).astype(input_dtype)
    B = x2d.shape[0]

    x_bytes = jnp.dtype(input_dtype).itemsize
    out_bytes = jnp.dtype(output_dtype).itemsize

    # --- weights: w1 matches the x streaming dtype (bf16 MXU path); the tiny
    # fc2/fc3 stay f32; fc3 is lane-padded to 128 output columns -------------
    w1c = w1.astype(input_dtype)
    b1r = jnp.reshape(b1, (1, -1)).astype(jnp.float32)
    w2c = w2.astype(jnp.float32)
    b2r = jnp.reshape(b2, (1, -1)).astype(jnp.float32)
    w3p = jnp.zeros((_H2, _OUT_PAD), jnp.float32).at[:, :_NUM_CLASSES].set(
        w3.astype(jnp.float32))
    b3p = jnp.full((1, _OUT_PAD), -1e30, jnp.float32).at[:, :_NUM_CLASSES].set(
        jnp.reshape(b3, (1, -1)).astype(jnp.float32))

    # --- batch tiling: sublane-packed tiles, padded tail ---------------------
    # bf16 packs 2 rows/sublane -> 16-row tiles; f32 -> 8-row tiles.
    sublane = max(8, 32 // x_bytes)
    bt = _round_up(min(batch_tile, B), sublane)
    # Ensure >= 2 grid steps for large batches so the "parallel" axis can be
    # sharded across both TensorCores on v7x.
    if B >= 512 and pl.cdiv(B, bt) == 1:
        bt = _round_up(pl.cdiv(B, 2), sublane)
    B_pad = _round_up(B, bt)
    if B_pad != B:
        x2d = jnp.pad(x2d, ((0, B_pad - B), (0, 0)))
    grid = (B_pad // bt,)

    def full(shape):
        # full-array block, independent of the batch grid index (VMEM-resident;
        # Pallas does not re-DMA blocks whose index never changes)
        return pl.BlockSpec(shape, lambda i: (0, 0))

    x_spec_kwargs = {}
    if x_buffers and x_buffers != 2:
        x_spec_kwargs["pipeline_mode"] = pl.Buffered(x_buffers)
    x_spec = pl.BlockSpec((bt, _IN_FEATURES), lambda i: (i, 0), **x_spec_kwargs)

    # --- VMEM footprint estimate (inputs + outputs + resident weights +
    # in-kernel intermediates), generation-aware cap -------------------------
    n_x_buf = max(2, x_buffers or 2)
    w_pad_bytes = (_IN_FEATURES * _OUT_PAD * x_bytes        # w1, lanes 20->128
                   + _round_up(_H1, 8) * _OUT_PAD * 4       # w2
                   + _round_up(_H2, 8) * _OUT_PAD * 4       # w3p
                   + 3 * 8 * _OUT_PAD * 4)                  # biases
    vmem_bytes = (n_x_buf * bt * _IN_FEATURES * x_bytes     # x pipeline buffers
                  + 2 * bt * _OUT_PAD * out_bytes           # output double-buffer
                  + 2 * w_pad_bytes                         # weight buffers
                  + 4 * bt * _OUT_PAD * 4)                  # h1/h2/logits/lse (f32)
    vmem_limit = None
    if vmem_bytes > 12 * 1024 * 1024:
        try:
            vmem_cap = getattr(pltpu.get_tpu_info(), "vmem_capacity_bytes",
                               64 * 1024 * 1024)
        except Exception:  # pragma: no cover - conservative fallback
            vmem_cap = 64 * 1024 * 1024
        vmem_limit = min(int(vmem_bytes * 1.25) + (2 << 20),
                         int(vmem_cap * 0.75))

    cost = pl.CostEstimate(
        flops=2 * B_pad * (_IN_FEATURES * _H1 + _H1 * _H2 + _H2 * _OUT_PAD),
        transcendentals=B_pad * (_OUT_PAD + 1),
        bytes_accessed=(B_pad * _IN_FEATURES * x_bytes
                        + B_pad * _OUT_PAD * out_bytes
                        + w_pad_bytes),
    )

    out = pl.pallas_call(
        _mlp_kernel,
        out_shape=jax.ShapeDtypeStruct((B_pad, _OUT_PAD), output_dtype),
        grid_spec=pltpu.PrefetchScalarGridSpec(
            num_scalar_prefetch=0,
            grid=grid,
            in_specs=[
                x_spec,                       # x tile (streamed, bf16 default)
                full((_IN_FEATURES, _H1)),    # w1 (input_dtype)
                full((1, _H1)),               # b1
                full((_H1, _H2)),             # w2
                full((1, _H2)),               # b2
                full((_H2, _OUT_PAD)),        # w3 (lane-padded)
                full((1, _OUT_PAD)),          # b3 (lane-padded, -1e30 pads)
            ],
            out_specs=pl.BlockSpec((bt, _OUT_PAD), lambda i: (i, 0)),
        ),
        compiler_params=pltpu.CompilerParams(
            dimension_semantics=("parallel",),   # v7x: shard batch grid across TCs
            vmem_limit_bytes=vmem_limit,
        ),
        cost_estimate=cost,
    )(x2d, w1c, b1r, w2c, b2r, w3p, b3p)

    if return_padded:
        # (B_pad, 128); columns 10..127 and rows B..B_pad are padding — the
        # consumer must slice (lets XLA fuse away the copy done below).
        return out
    # drop padded batch rows and padded output lanes
    return out[:B, :_NUM_CLASSES]


def init_params(key):
    """Deterministic init mimicking nn.Linear's U(-1/sqrt(fan_in), 1/sqrt(fan_in)).

    Returned weights are (in_features, out_features) — i.e. PyTorch weight.T.
    """
    def linear(key, fan_in, fan_out):
        kw, kb = jax.random.split(key)
        bound = 1.0 / jnp.sqrt(float(fan_in))
        w = jax.random.uniform(kw, (fan_in, fan_out), jnp.float32, -bound, bound)
        b = jax.random.uniform(kb, (1, fan_out), jnp.float32, -bound, bound)
        return w, b

    k1, k2, k3 = jax.random.split(key, 3)
    w1, b1 = linear(k1, _IN_FEATURES, _H1)
    w2, b2 = linear(k2, _H1, _H2)
    w3, b3 = linear(k3, _H2, _NUM_CLASSES)
    return (w1, b1, w2, b2, w3, b3)


def _reference_forward(x, params):
    """Pure-JAX reference for sanity checking."""
    w1, b1, w2, b2, w3, b3 = params
    x = x.reshape(-1, _IN_FEATURES).astype(jnp.float32)
    h1 = jnp.maximum(x @ w1 + b1, 0.0)
    h2 = jnp.maximum(h1 @ w2 + b2, 0.0)
    logits = h2 @ w3 + b3
    return jax.nn.log_softmax(logits, axis=1)


if __name__ == "__main__":
    key = jax.random.PRNGKey(0)
    k_params, k_x = jax.random.split(key)

    params = init_params(k_params)

    # Small MNIST-like input: batch=8, shape (8, 1, 28, 28) -> view(-1, 784)
    x = jax.random.normal(k_x, (8, 1, 28, 28), dtype=jnp.float32)
    ref = _reference_forward(x, params)

    # Strict f32 path (exact-numerics check of the fused kernel).
    out_f32 = jax.block_until_ready(
        net_dnn_forward(x, params, input_dtype=jnp.float32,
                        output_dtype=jnp.float32))
    assert out_f32.shape == (8, 10)
    assert jnp.allclose(out_f32, ref, atol=1e-5, rtol=1e-5), "f32 mismatch vs reference"

    # Default fast path: bf16 x stream + bf16 fc1 MXU (f32 accum) + bf16 output.
    out_fast = jax.block_until_ready(net_dnn_forward(x, params))
    assert out_fast.shape == (8, 10)
    assert jnp.allclose(out_fast.astype(jnp.float32), ref,
                        atol=5e-2, rtol=5e-2), "bf16 fast-path mismatch"

    # Non-multiple batch exercises the padded-tail path + multi-step grid.
    xb = jax.random.normal(jax.random.PRNGKey(1), (300, _IN_FEATURES),
                           dtype=jnp.float32)
    ref_b = _reference_forward(xb, params)
    out_b = jax.block_until_ready(net_dnn_forward(xb, params, batch_tile=256))
    assert out_b.shape == (300, 10)
    assert jnp.allclose(out_b.astype(jnp.float32), ref_b,
                        atol=5e-2, rtol=5e-2), "padded-batch mismatch"

    print("KERNEL_OK")
</pallas_src>

<mosaic_0001>
module attributes {stable_mosaic.version = 11 : i64} {
  func.func @_mlp_kernel(%arg0: i32, %arg1: memref<8x784xf32, #tpu.memory_space<vmem>>, %arg2: memref<784x20xf32, #tpu.memory_space<vmem>>, %arg3: memref<1x20xf32, #tpu.memory_space<vmem>>, %arg4: memref<20x10xf32, #tpu.memory_space<vmem>>, %arg5: memref<1x10xf32, #tpu.memory_space<vmem>>, %arg6: memref<10x128xf32, #tpu.memory_space<vmem>>, %arg7: memref<1x128xf32, #tpu.memory_space<vmem>>, %arg8: memref<8x128xf32, #tpu.memory_space<vmem>>) attributes {dimension_semantics = [#tpu.dimension_semantics<parallel>], iteration_bounds = array<i64: 1>, scalar_prefetch = 0 : i64, scratch_operands = 0 : i64, tpu.core_type = #tpu.core_type<tc>, window_params = [{transform_indices = @transform_0, window_bounds = array<i64: 8, 784>}, {pipeline_mode = #tpu.pipeline_mode<synchronous>, transform_indices = @transform_1, window_bounds = array<i64: 784, 20>}, {pipeline_mode = #tpu.pipeline_mode<synchronous>, transform_indices = @transform_2, window_bounds = array<i64: 1, 20>}, {pipeline_mode = #tpu.pipeline_mode<synchronous>, transform_indices = @transform_3, window_bounds = array<i64: 20, 10>}, {pipeline_mode = #tpu.pipeline_mode<synchronous>, transform_indices = @transform_4, window_bounds = array<i64: 1, 10>}, {pipeline_mode = #tpu.pipeline_mode<synchronous>, transform_indices = @transform_5, window_bounds = array<i64: 10, 128>}, {pipeline_mode = #tpu.pipeline_mode<synchronous>, transform_indices = @transform_6, window_bounds = array<i64: 1, 128>}, {transform_indices = @transform_7, window_bounds = array<i64: 8, 128>}]} {
    %c0 = arith.constant 0 : index
    %c0_0 = arith.constant 0 : index
    %0 = vector.load %arg1[%c0, %c0_0] : memref<8x784xf32, #tpu.memory_space<vmem>>, vector<8x784xf32>
    %c0_1 = arith.constant 0 : index
    %c0_2 = arith.constant 0 : index
    %1 = vector.load %arg2[%c0_1, %c0_2] : memref<784x20xf32, #tpu.memory_space<vmem>>, vector<784x20xf32>
    %cst = arith.constant dense<0.000000e+00> : vector<8x20xf32>
    %2 = tpu.matmul %0, %1, %cst {dimension_numbers = #tpu.dot_dimension_numbers<[1], [0], [0], [1], [0, 0, 1, 1], [], []>} : vector<8x784xf32>, vector<784x20xf32>, vector<8x20xf32> -> vector<8x20xf32>
    %c0_3 = arith.constant 0 : index
    %c0_4 = arith.constant 0 : index
    %3 = vector.load %arg3[%c0_3, %c0_4] : memref<1x20xf32, #tpu.memory_space<vmem>>, vector<1x20xf32>
    %4 = vector.broadcast %3 : vector<1x20xf32> to vector<8x20xf32>
    %5 = arith.addf %2, %4 : vector<8x20xf32>
    %cst_5 = arith.constant 0.000000e+00 : f32
    %6 = vector.broadcast %cst_5 : f32 to vector<8x20xf32>
    %7 = arith.maximumf %5, %6 : vector<8x20xf32>
    %c0_6 = arith.constant 0 : index
    %c0_7 = arith.constant 0 : index
    %8 = vector.load %arg4[%c0_6, %c0_7] : memref<20x10xf32, #tpu.memory_space<vmem>>, vector<20x10xf32>
    %cst_8 = arith.constant dense<0.000000e+00> : vector<8x10xf32>
    %9 = tpu.matmul %7, %8, %cst_8 {dimension_numbers = #tpu.dot_dimension_numbers<[1], [0], [0], [1], [0, 0, 1, 1], [], []>} : vector<8x20xf32>, vector<20x10xf32>, vector<8x10xf32> -> vector<8x10xf32>
    %c0_9 = arith.constant 0 : index
    %c0_10 = arith.constant 0 : index
    %10 = vector.load %arg5[%c0_9, %c0_10] : memref<1x10xf32, #tpu.memory_space<vmem>>, vector<1x10xf32>
    %11 = vector.broadcast %10 : vector<1x10xf32> to vector<8x10xf32>
    %12 = arith.addf %9, %11 : vector<8x10xf32>
    %cst_11 = arith.constant 0.000000e+00 : f32
    %13 = vector.broadcast %cst_11 : f32 to vector<8x10xf32>
    %14 = arith.maximumf %12, %13 : vector<8x10xf32>
    %c0_12 = arith.constant 0 : index
    %c0_13 = arith.constant 0 : index
    %15 = vector.load %arg6[%c0_12, %c0_13] : memref<10x128xf32, #tpu.memory_space<vmem>>, vector<10x128xf32>
    %cst_14 = arith.constant dense<0.000000e+00> : vector<8x128xf32>
    %16 = tpu.matmul %14, %15, %cst_14 {dimension_numbers = #tpu.dot_dimension_numbers<[1], [0], [0], [1], [0, 0, 1, 1], [], []>} : vector<8x10xf32>, vector<10x128xf32>, vector<8x128xf32> -> vector<8x128xf32>
    %c0_15 = arith.constant 0 : index
    %c0_16 = arith.constant 0 : index
    %17 = vector.load %arg7[%c0_15, %c0_16] : memref<1x128xf32, #tpu.memory_space<vmem>>, vector<1x128xf32>
    %18 = vector.broadcast %17 : vector<1x128xf32> to vector<8x128xf32>
    %19 = arith.addf %16, %18 : vector<8x128xf32>
    %cst_17 = arith.constant dense<0xFF800000> : vector<8xf32>
    %20 = vector.multi_reduction <maximumf>, %19, %cst_17 [1] : vector<8x128xf32> to vector<8xf32>
    %21 = vector.shape_cast %20 : vector<8xf32> to vector<8x1xf32>
    %22 = vector.broadcast %21 : vector<8x1xf32> to vector<8x128xf32>
    %23 = arith.subf %19, %22 : vector<8x128xf32>
    %24 = math.exp %23 : vector<8x128xf32>
    %cst_18 = arith.constant dense<0.000000e+00> : vector<8xf32>
    %25 = vector.multi_reduction <add>, %24, %cst_18 [1] : vector<8x128xf32> to vector<8xf32>
    %26 = vector.shape_cast %25 : vector<8xf32> to vector<8x1xf32>
    %27 = math.log %26 : vector<8x1xf32>
    %28 = vector.broadcast %27 : vector<8x1xf32> to vector<8x128xf32>
    %29 = arith.subf %23, %28 : vector<8x128xf32>
    %c0_19 = arith.constant 0 : index
    %c0_20 = arith.constant 0 : index
    %30 = vector.load %arg8[%c0_19, %c0_20] : memref<8x128xf32, #tpu.memory_space<vmem>>, vector<8x128xf32>
    tpu.vector_store %arg8[%c0_19, %c0_20], %29 {strides = array<i32>} : memref<8x128xf32, #tpu.memory_space<vmem>>, vector<8x128xf32>,
    return
  }
  func.func @transform_0(%arg0: i32) -> (i32, i32) {
    %c0_i32 = arith.constant 0 : i32
    %c0_i32_0 = arith.constant 0 : i32
    return %arg0, %c0_i32 : i32, i32
  }
  func.func @transform_1(%arg0: i32) -> (i32, i32) {
    %c0_i32 = arith.constant 0 : i32
    %c0_i32_0 = arith.constant 0 : i32
    %c0_i32_1 = arith.constant 0 : i32
    return %c0_i32, %c0_i32_0 : i32, i32
  }
  func.func @transform_2(%arg0: i32) -> (i32, i32) {
    %c0_i32 = arith.constant 0 : i32
    %c0_i32_0 = arith.constant 0 : i32
    %c0_i32_1 = arith.constant 0 : i32
    return %c0_i32, %c0_i32_0 : i32, i32
  }
  func.func @transform_3(%arg0: i32) -> (i32, i32) {
    %c0_i32 = arith.constant 0 : i32
    %c0_i32_0 = arith.constant 0 : i32
    %c0_i32_1 = arith.constant 0 : i32
    return %c0_i32, %c0_i32_0 : i32, i32
  }
  func.func @transform_4(%arg0: i32) -> (i32, i32) {
    %c0_i32 = arith.constant 0 : i32
    %c0_i32_0 = arith.constant 0 : i32
    %c0_i32_1 = arith.constant 0 : i32
    return %c0_i32, %c0_i32_0 : i32, i32
  }
  func.func @transform_5(%arg0: i32) -> (i32, i32) {
    %c0_i32 = arith.constant 0 : i32
    %c0_i32_0 = arith.constant 0 : i32
    %c0_i32_1 = arith.constant 0 : i32
    return %c0_i32, %c0_i32_0 : i32, i32
  }
  func.func @transform_6(%arg0: i32) -> (i32, i32) {
    %c0_i32 = arith.constant 0 : i32
    %c0_i32_0 = arith.constant 0 : i32
    %c0_i32_1 = arith.constant 0 : i32
    return %c0_i32, %c0_i32_0 : i32, i32
  }
  func.func @transform_7(%arg0: i32) -> (i32, i32) {
    %c0_i32 = arith.constant 0 : i32
    %c0_i32_0 = arith.constant 0 : i32
    return %arg0, %c0_i32 : i32, i32
  }
}

</mosaic_0001>

<bundles_post_ra>
// kernel: tpu_custom_call.1
= control target key start
LH: loop header
LB: loop body
LE: loop exit
PB: predicated region body
PF: predicated region fallthrough
CT: control target
= control target key end

     0   :  { %s1198_s0 = inlined_call_operand.vmem [shape: f32[8,784], index: 0, kind: input, shape index: {}]   ;;  %s1199_s1 = inlined_call_operand.vmem [shape: f32[784,20], index: 1, kind: input, shape index: {}]   ;;  %s1200_s2 = inlined_call_operand.vmem [shape: f32[1,20], index: 2, kind: input, shape index: {}]   ;;  %s1201_s3 = inlined_call_operand.vmem [shape: f32[20,10], index: 3, kind: input, shape index: {}]   ;;  %s1202_s4 = inlined_call_operand.vmem [shape: f32[1,10], index: 4, kind: input, shape index: {}]   ;;  %s1203_s5 = inlined_call_operand.vmem [shape: f32[10,128], index: 5, kind: input, shape index: {}]   ;;  %s1204_s6 = inlined_call_operand.vmem [shape: f32[1,128], index: 6, kind: input, shape index: {}]   ;;  %s1205_s7 = inlined_call_operand.hbm [shape: f32[8,128], index: 7, kind: output, shape index: {}]  }
   0x1   :  { %v65_v0 = vld [vmem:[%s1199_s1 + $0xf8] sm:$0xff]  ;;  %v64_v2 = vld [vmem:[%s1199_s1 + $0xf0] sm:$0xff]  ;;  %v63_v6 = vld [vmem:[%s1199_s1 + $0xe8] sm:$0xff] }
   0x2   :  { %v49_v1 = vld [vmem:[%s1199_s1 + $0x78] sm:$0xff]  ;;  %633 = vmatprep.subr.mxu0 %v65_v0  ;;  %v48_v4 = vld [vmem:[%s1199_s1 + $0x70] sm:$0xff]  ;;  %v47_v8 = vld [vmem:[%s1199_s1 + $0x68] sm:$0xff] }
   0x3   :  { %v97_v3 = vld [vmem:[%s1199_s1 + $0x1f8] sm:$0xff]  ;;  %634 = vmatpush3.msra.mxu0 %v49_v1  ;;  %v96_v7 = vld [vmem:[%s1199_s1 + $0x1f0] sm:$0xff]  ;;  %v95_v10 = vld [vmem:[%s1199_s1 + $0x1e8] sm:$0xff] }
   0x4   :  { %v81_v5 = vld [vmem:[%s1199_s1 + $0x178] sm:$0xff]  ;;  %668 = vmatprep.subr.mxu1 %v97_v3  ;;  %635 = vmatprep.subr.mxu0 %v64_v2  ;;  %v80_v9 = vld [vmem:[%s1199_s1 + $0x170] sm:$0xff]  ;;  %v62_v11 = vld [vmem:[%s1199_s1 + $0xe0] sm:$0xff] }
   0x5   :  { %669 = vmatpush3.msra.mxu1 %v81_v5  ;;  %636 = vmatpush3.msra.mxu0 %v48_v4  ;;  %v79_v12 = vld [vmem:[%s1199_s1 + $0x168] sm:$0xff]  ;;  %v46_v13 = vld [vmem:[%s1199_s1 + $0x60] sm:$0xff]  ;;  %v61_v15 = vld [vmem:[%s1199_s1 + $0xd8] sm:$0xff] }
   0x6   :  { %670 = vmatprep.subr.mxu1 %v96_v7  ;;  %637 = vmatprep.subr.mxu0 %v63_v6  ;;  %v94_v14 = vld [vmem:[%s1199_s1 + $0x1e0] sm:$0xff]  ;;  %v45_v17 = vld [vmem:[%s1199_s1 + $0x58] sm:$0xff]  ;;  %v60_v19 = vld [vmem:[%s1199_s1 + $0xd0] sm:$0xff] }
   0x7   :  { %671 = vmatpush3.msra.mxu1 %v80_v9  ;;  %638 = vmatpush3.msra.mxu0 %v47_v8  ;;  %v78_v16 = vld [vmem:[%s1199_s1 + $0x160] sm:$0xff]  ;;  %v93_v18 = vld [vmem:[%s1199_s1 + $0x1d8] sm:$0xff]  ;;  %v44_v21 = vld [vmem:[%s1199_s1 + $0x50] sm:$0xff] }
   0x8   :  { %672 = vmatprep.subr.mxu1 %v95_v10  ;;  %639 = vmatprep.subr.mxu0 %v62_v11  ;;  %v77_v20 = vld [vmem:[%s1199_s1 + $0x158] sm:$0xff]  ;;  %v92_v22 = vld [vmem:[%s1199_s1 + $0x1d0] sm:$0xff]  ;;  %v59_v23 = vld [vmem:[%s1199_s1 + $0xc8] sm:$0xff] }
   0x9   :  { %673 = vmatpush3.msra.mxu1 %v79_v12  ;;  %640 = vmatpush3.msra.mxu0 %v46_v13  ;;  %v76_v24 = vld [vmem:[%s1199_s1 + $0x150] sm:$0xff]  ;;  %v43_v25 = vld [vmem:[%s1199_s1 + $0x48] sm:$0xff]  ;;  %v58_v27 = vld [vmem:[%s1199_s1 + $0xc0] sm:$0xff] }
   0xa   :  { %674 = vmatprep.subr.mxu1 %v94_v14  ;;  %641 = vmatprep.subr.mxu0 %v61_v15  ;;  %v91_v26 = vld [vmem:[%s1199_s1 + $0x1c8] sm:$0xff]  ;;  %v42_v29 = vld [vmem:[%s1199_s1 + $0x40] sm:$0xff]  ;;  %v57_v31 = vld [vmem:[%s1199_s1 + $0xb8] sm:$0xff] }
   0xb   :  { %675 = vmatpush3.msra.mxu1 %v78_v16  ;;  %642 = vmatpush3.msra.mxu0 %v45_v17  ;;  %v75_v28 = vld [vmem:[%s1199_s1 + $0x148] sm:$0xff]  ;;  %v90_v30 = vld [vmem:[%s1199_s1 + $0x1c0] sm:$0xff]  ;;  %v41_v33 = vld [vmem:[%s1199_s1 + $0x38] sm:$0xff] }
   0xc   :  { %676 = vmatprep.subr.mxu1 %v93_v18  ;;  %643 = vmatprep.subr.mxu0 %v60_v19  ;;  %v74_v32 = vld [vmem:[%s1199_s1 + $0x140] sm:$0xff]  ;;  %v89_v34 = vld [vmem:[%s1199_s1 + $0x1b8] sm:$0xff]  ;;  %v56_v35 = vld [vmem:[%s1199_s1 + $0xb0] sm:$0xff] }
   0xd   :  { %677 = vmatpush3.msra.mxu1 %v77_v20  ;;  %644 = vmatpush3.msra.mxu0 %v44_v21  ;;  %v73_v36 = vld [vmem:[%s1199_s1 + $0x138] sm:$0xff]  ;;  %v40_v37 = vld [vmem:[%s1199_s1 + $0x30] sm:$0xff]  ;;  %v55_v39 = vld [vmem:[%s1199_s1 + $0xa8] sm:$0xff] }
   0xe   :  { %678 = vmatprep.subr.mxu1 %v92_v22  ;;  %645 = vmatprep.subr.mxu0 %v59_v23  ;;  %v88_v38 = vld [vmem:[%s1199_s1 + $0x1b0] sm:$0xff]  ;;  %v39_v41 = vld [vmem:[%s1199_s1 + $0x28] sm:$0xff]  ;;  %v54_v43 = vld [vmem:[%s1199_s1 + $0xa0] sm:$0xff] }
   0xf   :  { %679 = vmatpush3.msra.mxu1 %v76_v24  ;;  %646 = vmatpush3.msra.mxu0 %v43_v25  ;;  %v72_v40 = vld [vmem:[%s1199_s1 + $0x130] sm:$0xff]  ;;  %v87_v42 = vld [vmem:[%s1199_s1 + $0x1a8] sm:$0xff]  ;;  %v38_v45 = vld [vmem:[%s1199_s1 + $0x20] sm:$0xff] }
  0x10   :  { %680 = vmatprep.subr.mxu1 %v91_v26  ;;  %647 = vmatprep.subr.mxu0 %v58_v27  ;;  %v71_v44 = vld [vmem:[%s1199_s1 + $0x128] sm:$0xff]  ;;  %v86_v46 = vld [vmem:[%s1199_s1 + $0x1a0] sm:$0xff]  ;;  %v53_v47 = vld [vmem:[%s1199_s1 + $0x98] sm:$0xff] }
  0x11   :  { %681 = vmatpush3.msra.mxu1 %v75_v28  ;;  %648 = vmatpush3.msra.mxu0 %v42_v29  ;;  %v70_v48 = vld [vmem:[%s1199_s1 + $0x120] sm:$0xff]  ;;  %v37_v49 = vld [vmem:[%s1199_s1 + $0x18] sm:$0xff]  ;;  %v52_v51 = vld [vmem:[%s1199_s1 + $0x90] sm:$0xff] }
  0x12   :  { %682 = vmatprep.subr.mxu1 %v90_v30  ;;  %649 = vmatprep.subr.mxu0 %v57_v31  ;;  %v85_v50 = vld [vmem:[%s1199_s1 + $0x198] sm:$0xff]  ;;  %v36_v53 = vld [vmem:[%s1199_s1 + $0x10] sm:$0xff]  ;;  %v51_v55 = vld [vmem:[%s1199_s1 + $0x88] sm:$0xff] }
  0x13   :  { %683 = vmatpush3.msra.mxu1 %v74_v32  ;;  %650 = vmatpush3.msra.mxu0 %v41_v33  ;;  %v69_v52 = vld [vmem:[%s1199_s1 + $0x118] sm:$0xff]  ;;  %v84_v54 = vld [vmem:[%s1199_s1 + $0x190] sm:$0xff]  ;;  %v35_v57 = vld [vmem:[%s1199_s1 + $0x8] sm:$0xff] }
  0x14   :  { %684 = vmatprep.subr.mxu1 %v89_v34  ;;  %651 = vmatprep.subr.mxu0 %v56_v35  ;;  %v68_v56 = vld [vmem:[%s1199_s1 + $0x110] sm:$0xff]  ;;  %v83_v58 = vld [vmem:[%s1199_s1 + $0x188] sm:$0xff]  ;;  %v50_v59 = vld [vmem:[%s1199_s1 + $0x80] sm:$0xff] }
  0x15   :  { %685 = vmatpush3.msra.mxu1 %v73_v36  ;;  %652 = vmatpush3.msra.mxu0 %v40_v37  ;;  %v28_v60 = vld [vmem:[%s1198_s0 + $0x8] sm:$0xff]  ;;  %v34_v61 = vld [vmem:[%s1199_s1] sm:$0xff]  ;;  %v129_v1 = vld [vmem:[%s1199_s1 + $0x2f8] sm:$0xff] }
  0x16   :  { %686 = vmatprep.subr.mxu1 %v88_v38  ;;  %653 = vmatprep.subr.mxu0 %v55_v39  ;;  %v67_v62 = vld [vmem:[%s1199_s1 + $0x108] sm:$0xff]  ;;  %v27_v63 = vld [vmem:[%s1198_s0] sm:$0xff]  ;;  %v30_v3 = vld [vmem:[%s1198_s0 + $0x18] sm:$0xff] }
  0x17   :  { %687 = vmatpush3.msra.mxu1 %v72_v40  ;;  %654 = vmatpush3.msra.mxu0 %v39_v41  ;;  %v82_v0 = vld [vmem:[%s1199_s1 + $0x180] sm:$0xff]  ;;  %v113_v4 = vld [vmem:[%s1199_s1 + $0x278] sm:$0xff]  ;;  %v29_v5 = vld [vmem:[%s1198_s0 + $0x10] sm:$0xff] }
  0x18   :  { %688 = vmatprep.subr.mxu1 %v87_v42  ;;  %655 = vmatprep.subr.mxu0 %v54_v43  ;;  %v66_v2 = vld [vmem:[%s1199_s1 + $0x100] sm:$0xff]  ;;  %v128_v6 = vld [vmem:[%s1199_s1 + $0x2f0] sm:$0xff]  ;;  %v32_v8 = vld [vmem:[%s1198_s0 + $0x28] sm:$0xff] }
  0x19   :  { %689 = vmatpush3.msra.mxu1 %v71_v44  ;;  %656 = vmatpush3.msra.mxu0 %v38_v45  ;;  %v112_v7 = vld [vmem:[%s1199_s1 + $0x270] sm:$0xff]  ;;  %v127_v9 = vld [vmem:[%s1199_s1 + $0x2e8] sm:$0xff] }
  0x1a   :  { %690 = vmatprep.subr.mxu1 %v86_v46  ;;  %657 = vmatprep.subr.mxu0 %v53_v47 }
  0x1b   :  { %691 = vmatpush3.msra.mxu1 %v70_v48  ;;  %658 = vmatpush3.msra.mxu0 %v37_v49 }
  0x1c   :  { %692 = vmatprep.subr.mxu1 %v85_v50  ;;  %659 = vmatprep.subr.mxu0 %v52_v51 }
  0x1d   :  { %693 = vmatpush3.msra.mxu1 %v69_v52  ;;  %660 = vmatpush3.msra.mxu0 %v36_v53 }
  0x1e   :  { %694 = vmatprep.subr.mxu1 %v84_v54  ;;  %661 = vmatprep.subr.mxu0 %v51_v55 }
  0x1f   :  { %695 = vmatpush3.msra.mxu1 %v68_v56  ;;  %662 = vmatpush3.msra.mxu0 %v35_v57 }
  0x20   :  { %696 = vmatprep.subr.mxu1 %v83_v58  ;;  %663 = vmatprep.subr.mxu0 %v50_v59 }
  0x21   :  { %207 = vmatprep.mubr.f32.mxu0 %v28_v60  ;;  %664 = vmatpush3.msra.mxu0 %v34_v61 }
  0x22   :  { %697 = vmatpush3.msra.mxu1 %v67_v62  ;;  %208 = vmatmul.mubr.f32.vlgmr.msra.gmra.mxu0 %v27_v63 }
  0x23   :  { %698 = vmatprep.subr.mxu1 %v82_v0  ;;  %703 = vmatprep.subr.mxu0 %v129_v1 }
  0x24   :  { %699 = vmatpush3.msra.mxu1 %v66_v2  ;;  %277 = vmatprep.mubr.f32.mxu1 %v30_v3 }
  0x25   :  { %704 = vmatpush3.msra.mxu0 %v113_v4 }
  0x26   :  { %12 = vsyncpa [#allocation3], 0  ;;  %278 = vmatmul.mubr.f32.vlgmr.msra.gmra.mxu1 %v29_v5  ;;  %705 = vmatprep.subr.mxu0 %v128_v6  ;;  %v111_v10 = vld [vmem:[%s1199_s1 + $0x268] sm:$0xff]  ;;  %v126_v12 = vld [vmem:[%s1199_s1 + $0x2e0] sm:$0xff]  ;;  %v800_v14 = vmov 0.0   ;;  %vm139_vm0 = vcmask 130048  }
  0x27   :  { %v131_v11 = vld [vmem:[%s1199_s1 + $0x308] sm:$0xff]  ;;  %706 = vmatpush3.msra.mxu0 %v112_v7  ;;  %347 = vmatprep.mubr.f32.mxu0 %v32_v8  ;;  %v110_v13 = vld [vmem:[%s1199_s1 + $0x260] sm:$0xff]  ;;  %v125_v16 = vld [vmem:[%s1199_s1 + $0x2d8] sm:$0xff]  ;;  %vm801_vm1 = vmmov 0   ;;  %vm438_vm2 = vcmask 1043456   ;;  %vm434_vm3 = vcmask 162816  }
  0x28   :  { %707 = vmatprep.subr.mxu0 %v127_v9  ;;  %748 = vmatprep.subr.mxu1 %v800_v14  ;;  %v130_v15 = vld [vmem:[%s1199_s1 + $0x300] sm:$0xff]  ;;  %v109_v17 = vld [vmem:[%s1199_s1 + $0x258] sm:$0xff]  ;;  %v33_v18 = vld [vmem:[%s1198_s0 + $0x30] sm:$0xff]  ;;  %vm526_vm4 = vcmask 1041408   ;;  %vm522_vm5 = vcmask 80896  }
  0x29   :  { %708 = vmatpush3.msra.mxu0 %v111_v10  ;;  %749 = vmatpush3.msra.mxu1 %v131_v11  ;;  %v124_v19 = vld [vmem:[%s1199_s1 + $0x2d0] sm:$0xff]  ;;  %v123_v21 = vld [vmem:[%s1199_s1 + $0x2c8] sm:$0xff]  ;;  %v122_v23 = vld [vmem:[%s1199_s1 + $0x2c0] sm:$0xff] }
  0x2a   :  { %709 = vmatprep.subr.mxu0 %v126_v12  ;;  %750 = vmatprep.subr.mxu1 %v800_v14  ;;  %v108_v20 = vld [vmem:[%s1199_s1 + $0x250] sm:$0xff]  ;;  %v107_v22 = vld [vmem:[%s1199_s1 + $0x248] sm:$0xff]  ;;  %v106_v24 = vld [vmem:[%s1199_s1 + $0x240] sm:$0xff] }
  0x2b   :  { %710 = vmatpush3.msra.mxu0 %v110_v13  ;;  %751 = vmatpush3.msra.mxu1 %v130_v15  ;;  %v121_v25 = vld [vmem:[%s1199_s1 + $0x2b8] sm:$0xff]  ;;  %v120_v27 = vld [vmem:[%s1199_s1 + $0x2b0] sm:$0xff]  ;;  %v119_v29 = vld [vmem:[%s1199_s1 + $0x2a8] sm:$0xff] }
  0x2c   :  { %711 = vmatprep.subr.mxu0 %v125_v16  ;;  %752 = vmatprep.mubr.msk.f32.mxu1 %vm801_vm1, %v800_v14  ;;  %v105_v26 = vld [vmem:[%s1199_s1 + $0x238] sm:$0xff]  ;;  %v104_v28 = vld [vmem:[%s1199_s1 + $0x230] sm:$0xff]  ;;  %v103_v30 = vld [vmem:[%s1199_s1 + $0x228] sm:$0xff] }
  0x2d   :  { %712 = vmatpush3.msra.mxu0 %v109_v17  ;;  %753 = vmatmul.mubr.msk.f32.vlgmr.msra.gmra.mxu1 %vm139_vm0, %v33_v18  ;;  %v118_v31 = vld [vmem:[%s1199_s1 + $0x2a0] sm:$0xff]  ;;  %v117_v33 = vld [vmem:[%s1199_s1 + $0x298] sm:$0xff]  ;;  %v116_v35 = vld [vmem:[%s1199_s1 + $0x290] sm:$0xff] }
  0x2e   :  { %713 = vmatprep.subr.mxu0 %v124_v19  ;;  %755 = vmatprep.subr.mxu1 %v800_v14  ;;  %v102_v32 = vld [vmem:[%s1199_s1 + $0x220] sm:$0xff]  ;;  %v101_v34 = vld [vmem:[%s1199_s1 + $0x218] sm:$0xff]  ;;  %v100_v36 = vld [vmem:[%s1199_s1 + $0x210] sm:$0xff] }
  0x2f   :  { %714 = vmatpush3.msra.mxu0 %v108_v20  ;;  %761 = vmatprep.mubr.msk.f32.mxu1 %vm801_vm1, %v800_v14  ;;  %v115_v37 = vld [vmem:[%s1199_s1 + $0x288] sm:$0xff]  ;;  %v114_v39 = vld [vmem:[%s1199_s1 + $0x280] sm:$0xff]  ;;  %v426_v42 = vld [vmem:[%s1201_s3 + $0x10] sm:$0xf] }
  0x30   :  { %715 = vmatprep.subr.mxu0 %v123_v21  ;;  %v99_v38 = vld [vmem:[%s1199_s1 + $0x208] sm:$0xff]  ;;  %v98_v40 = vld [vmem:[%s1199_s1 + $0x200] sm:$0xff]  ;;  %756 = vmatpush3.msk.msra.mxu1 %vm438_vm2, %v426_v42 }
  0x31   :  { %716 = vmatpush3.msra.mxu0 %v107_v22  ;;  %v31_v41 = vld [vmem:[%s1198_s0 + $0x20] sm:$0xff]  ;;  %757 = vmatprep.subr.mxu1 %v800_v14  ;;  %v425_v43 = vld [vmem:[%s1201_s3 + $0x8] sm:$0xff] }
  0x32   :  { %717 = vmatprep.subr.mxu0 %v122_v23  ;;  %758 = vmatpush3.msra.mxu1 %v425_v43  ;;  %v424_v44 = vld [vmem:[%s1201_s3] sm:$0xff]  ;;  %v514_v62 = vld [vmem:[%s1203_s5 + $0x8] sm:$0x3] }
  0x33   :  { %718 = vmatpush3.msra.mxu0 %v106_v24  ;;  %759 = vmatprep.subr.mxu1 %v800_v14  ;;  %v625_v52 = vld [vmem:[%s1200_s2] ss:$0 sm:$0xff] }
  0x34   :  { %719 = vmatprep.subr.mxu0 %v121_v25  ;;  %760 = vmatpush3.msra.mxu1 %v424_v44  ;;  %v513_v63 = vld [vmem:[%s1203_s5] sm:$0xff] }
  0x35   :  { %720 = vmatpush3.msra.mxu0 %v105_v26  ;;  %764 = vmatprep.subr.mxu1 %v800_v14  ;;  %v627_v0 = vld [vmem:[%s1202_s4] ss:$0 sm:$0xff]  ;;  %s802_s4 = smov [#allocation2]  }
  0x36   :  { %721 = vmatprep.subr.mxu0 %v120_v27  ;;  %v630_v5 = vld [vmem:[%s1204_s6] ss:$0 sm:$0xff]  ;;  %s617_s5 = sshll.u32 %s802_s4, 4  ;;  %s618_s5 = int_to_ptr.vmem [resolvable:$true] %s617_s5 }
  0x37   :  { %722 = vmatpush3.msra.mxu0 %v104_v28  ;;  %s778_s6 = scalar_lea.vmem %s618_s5, 128  ;;  %p783_p1 = scmp.lt.s32.totalorder %s618_s5, %s618_s5 }
  0x38   :  { %723 = vmatprep.subr.mxu0 %v119_v29  ;;  %p779_p0 = scmp.ne.s32.totalorder %s618_s5, %s778_s6  ;;  %p784_p2 = scmp.lt.s32.totalorder %s778_s6, %s778_s6 }
  0x39   :  { %724 = vmatpush3.msra.mxu0 %v103_v30 }
  0x3a   :  { %725 = vmatprep.subr.mxu0 %v118_v31  ;;  %p785_p3 = por %p784_p2, %p783_p1 }
  0x3b   :  { %726 = vmatpush3.msra.mxu0 %v102_v32 }
  0x3c   :  { %727 = vmatprep.subr.mxu0 %v117_v33  ;;  %p786_p4 = pnand %p785_p3, %p779_p0 }
  0x3d   :  { %728 = vmatpush3.msra.mxu0 %v101_v34 }
  0x3e   :  { %729 = vmatprep.subr.mxu0 %v116_v35 }
  0x3f   :  { %730 = vmatpush3.msra.mxu0 %v100_v36 }
  0x40   :  { %731 = vmatprep.subr.mxu0 %v115_v37 }
  0x41   :  { %732 = vmatpush3.msra.mxu0 %v99_v38 }
  0x42   :  { %733 = vmatprep.subr.mxu0 %v114_v39 }
  0x43   :  { %734 = vmatpush3.msra.mxu0 %v98_v40 }
  0x44   :  { %348 = vmatmul.mubr.f32.vlgmr.msra.gmra.mxu0 %v31_v41 }
  0xe2   :  { %v665_v49 = vpop.f32.mrf.mxu0 }
  0xe4   :  { %v666_v50 = vpop.f32.mrf.mxu0 }
  0xe5   :  { %v667_v51 = vadd.f32 %v666_v50, %v665_v49 }
  0xe6   :  { %v700_v45 = vpop.f32.mrf.mxu1 }
  0xe7   :  { %v210_v53 = vadd.f32 %v667_v51, %v625_v52 }
  0xe8   :  { %v701_v46 = vpop.f32.mrf.mxu1 }
  0xe9   :  { %v702_v54 = vadd.f32 %v701_v46, %v700_v45 }
  0xeb   :  { %v280_v57 = vadd.f32 %v702_v54, %v210_v53 }
  0xed   :  { %v419_v47 = vpop.f32.mrf.mxu1 }
  0xef   :  { %v754_v48 = vpop.f32.mrf.mxu1 }
 0x104   :  { %v735_v55 = vpop.f32.mrf.mxu0 }
 0x106   :  { %v736_v56 = vpop.f32.mrf.mxu0 }
 0x107   :  { %v737_v58 = vadd.f32 %v736_v56, %v735_v55 }
 0x109   :  { %v350_v59 = vadd.f32 %v737_v58, %v280_v57 }
 0x10b   :  { %v420_v60 = vadd.f32 %v419_v47, %v350_v59 }
 0x10d   :  { %v423_v61 = vmax.f32 %v420_v60, 0.0 }
 0x10f   :  { %762 = vmatmul.mubr.msk.f32.vlgmr.msra.gmra.mxu1 %vm434_vm3, %v423_v61 }
 0x110   :  { %768 = vmatprep.mubr.msk.f32.mxu1 %vm801_vm1, %v800_v14  ;;  %765 = vmatpush3.msk.msra.mxu1 %vm526_vm4, %v514_v62 }
 0x111   :  { %766 = vmatprep.subr.mxu1 %v800_v14 }
 0x112   :  { %767 = vmatpush3.msra.mxu1 %v513_v63 }
 0x1cf   :  { %v508_v1 = vpop.f32.mrf.mxu1 }
 0x1d0   :  { %v509_v2 = vadd.f32 %v627_v0, %v508_v1 }
 0x1d1   :  { %v763_v3 = vpop.f32.mrf.mxu1 }
 0x1d2   :  { %v512_v4 = vmax.f32 %v509_v2, 0.0 }
 0x1d4   :  { %769 = vmatmul.mubr.msk.f32.vlgmr.msra.gmra.mxu1 %vm522_vm5, %v512_v4 }
 0x294   :  { %v596_v6 = vpop.f32.mrf.mxu1 }
 0x295   :  { %v597_v7 = vadd.f32 %v630_v5, %v596_v6 }
 0x296   :  { %v770_v8 = vpop.f32.mrf.mxu1 }
 0x297   :  { %600 = vmax.xlane.f32.xlu0 %v597_v7 }
 0x320   :  { %v601_v9 = vpop.xlane.xlu0 %600 }
 0x321   :  { %v602_v10 = vsub.f32 %v597_v7, %v601_v9 }
 0x323   :  { %v603_v11 = vmul.f32 1.442695, %v602_v10 }
 0x325   :  { %774 = vpow2.f32 %v603_v11 }
 0x332   :  { %v775_v12 = vpop.eup %774 }
 0x333   :  { %605 = vadd.xlane.f32.xlu0 %v775_v12 }
 0x3bc   :  { %v606_v13 = vpop.xlane.xlu0 %605 }
 0x3bd   :  { %776 = vlog2.f32 %v606_v13 }
 0x3ca   :  { %v777_v14 = vpop.eup %776 }
 0x3cb   :  { %v608_v15 = vmul.f32 0.6931472, %v777_v14 }
 0x3cd   :  { %v609_v16 = vsub.f32 %v602_v10, %v608_v15 }
 0x3cf   :  { %610 = vst [vmem:[#allocation2] sm:$0xff] %v609_v16 }
 0x3d0   :  { %789 = shalt.err (!%p786_p4)
}
 0x3d1   :  { %620 = dma.vmem_to_hbm [thread:$0]  %s618_s5, 128, %s1205_s7, [#allocation3]  }
 0x3d2   :  { %798 = dma.done.wait [#allocation3], 128  }
 0x3d3   :  { %799 = vsyncadd [#allocation3], 4294967168 }
 0x3d4   :  { %624 = vsyncpa [#allocation3], 1 }

</bundles_post_ra>
